<compile_context>
chip_gen: v7x
topology: tpu7x:2x2x1
jax: 0.10.0
libtpu: 0.0.40
codegen_flags: <defaults>
</compile_context>

<pallas_src>
import functools

import jax
import jax.numpy as jnp
from jax import lax
from jax.experimental import pallas as pl
from jax.experimental.pallas import tpu as pltpu


LANE = 128      # pad feature / hidden / class dims to this for lane-dense vregs & stores
TILE_M = 128    # node-row tile
TILE_K = 128    # adjacency-column (reduction) tile


# ----------------------------- Pallas kernel ---------------------------------
def _gcn_layer_kernel(a_ref, x_ref, w_ref, out_ref, acc_ref, *,
                      epilogue, ones_col, valid_cols):
    """One GCN layer on a (row-tile, reduction-tile) grid.

    a_ref  : [TILE_M, TILE_K]  bf16  normalized-adjacency tile at (i, k)
    x_ref  : [TILE_K, LANE]    bf16  augmented node features ([X | 1 | 0...]) for column block k
    w_ref  : [LANE,  LANE]     bf16  augmented weights ([W ; b ; 0...]), grid-resident
    out_ref: [TILE_M, LANE]          layer output tile (row block i)
    acc_ref: [TILE_M, LANE]    f32   scratch accumulator for sum_k A[i,k] @ X[k]

    Because W_aug carries the bias in the row matching X's ones-column:
        (A @ X_aug) @ W_aug == (A @ X) @ W + rowsum(A) * b == A @ (X @ W + b).
    """
    k = pl.program_id(1)

    @pl.when(k == 0)
    def _init():
        acc_ref[...] = jnp.zeros_like(acc_ref)

    # O(N^2)-scale aggregation: bf16 operands on the MXU, f32 accumulate.
    acc_ref[...] += jnp.dot(a_ref[...], x_ref[...],
                            preferred_element_type=jnp.float32)

    @pl.when(k == pl.num_programs(1) - 1)
    def _finalize():
        # Per-row-tile linear transform + fused epilogue (done once per row tile).
        h = jnp.dot(acc_ref[...].astype(jnp.bfloat16), w_ref[...],
                    preferred_element_type=jnp.float32)
        col = lax.broadcasted_iota(jnp.int32, h.shape, 1)
        if epilogue == "relu_ones":
            # ReLU, then plant an exact ones-column so the *next* layer's bias
            # can ride the same augmented-matmul trick.
            o = jnp.maximum(h, 0.0)
            o = jnp.where(col == ones_col, 1.0, o)
        else:  # "log_softmax" over the first `valid_cols` (real class) columns
            z = jnp.where(col < valid_cols, h, -1e30)      # mask padded class lanes
            m = jnp.max(z, axis=1, keepdims=True)
            s = z - m
            e = jnp.where(col < valid_cols, jnp.exp(s), 0.0)
            lse = jnp.log(jnp.sum(e, axis=1, keepdims=True))
            o = jnp.where(col < valid_cols, s - lse, 0.0)
        out_ref[...] = o.astype(out_ref.dtype)


def gcn_layer(a_hat, x_aug, w_aug, *, epilogue, ones_col=0, valid_cols=0,
              out_dtype=jnp.float32):
    """out[Np, LANE] = epilogue( (A_hat @ x_aug) @ w_aug ), tiled over rows & reduction."""
    Np = a_hat.shape[0]
    Fp = x_aug.shape[1]
    Hp = w_aug.shape[1]
    assert Np % TILE_M == 0 and Np % TILE_K == 0
    grid = (Np // TILE_M, Np // TILE_K)

    kernel = functools.partial(_gcn_layer_kernel, epilogue=epilogue,
                               ones_col=ones_col, valid_cols=valid_cols)

    flops = 2 * Np * Np * Fp + 2 * Np * Fp * Hp
    transcendentals = Np * Hp if epilogue == "log_softmax" else 0
    bytes_accessed = (a_hat.size * a_hat.dtype.itemsize
                      + x_aug.size * x_aug.dtype.itemsize
                      + w_aug.size * w_aug.dtype.itemsize
                      + Np * Hp * jnp.dtype(out_dtype).itemsize)

    return pl.pallas_call(
        kernel,
        out_shape=jax.ShapeDtypeStruct((Np, Hp), out_dtype),
        grid_spec=pltpu.PrefetchScalarGridSpec(
            num_scalar_prefetch=0,
            grid=grid,
            in_specs=[
                pl.BlockSpec((TILE_M, TILE_K), lambda i, k: (i, k)),  # A_hat tile
                pl.BlockSpec((TILE_K, Fp), lambda i, k: (k, 0)),      # X_aug column block
                pl.BlockSpec((Fp, Hp), lambda i, k: (0, 0)),          # W_aug (resident)
            ],
            out_specs=pl.BlockSpec((TILE_M, Hp), lambda i, k: (i, 0)),
            scratch_shapes=[pltpu.VMEM((TILE_M, Fp), jnp.float32)],
        ),
        compiler_params=pltpu.CompilerParams(
            dimension_semantics=("parallel", "arbitrary"),
            vmem_limit_bytes=32 * 1024 * 1024,
        ),
        cost_estimate=pl.CostEstimate(
            flops=flops, transcendentals=transcendentals,
            bytes_accessed=bytes_accessed),
    )(a_hat, x_aug, w_aug)


def gcn_forward(a_hat_bf16, x_aug_bf16, w1_aug_bf16, w2_aug_bf16,
                num_nodes, hidden, num_classes):
    # conv1: relu(A @ (X W1 + b1)); output also carries an exact ones-column at `hidden`.
    h1 = gcn_layer(a_hat_bf16, x_aug_bf16, w1_aug_bf16,
                   epilogue="relu_ones", ones_col=hidden,
                   out_dtype=jnp.bfloat16)
    # TODO(synk): F.dropout(training=True) path not implemented; eval-mode identity used.
    # conv2 + log_softmax over the real classes.
    out = gcn_layer(a_hat_bf16, h1, w2_aug_bf16,
                    epilogue="log_softmax", valid_cols=num_classes,
                    out_dtype=jnp.float32)
    return out[:num_nodes, :num_classes]


# --------------------------- glue (plain JAX) ---------------------------------
def round_up(x, m):
    return ((x + m - 1) // m) * m


def build_normalized_adjacency(edge_index, num_nodes, num_padded):
    """GCNConv's add_self_loops + degree(col)^-1/2 symmetric norm, densified and
    zero-padded to [num_padded, num_padded] so aggregation becomes a tiled matmul."""
    row, col = edge_index[0], edge_index[1]
    loops = jnp.arange(num_nodes, dtype=edge_index.dtype)
    row = jnp.concatenate([row, loops])
    col = jnp.concatenate([col, loops])
    deg = jnp.zeros((num_nodes,), jnp.float32).at[col].add(1.0)
    deg_inv_sqrt = jnp.where(deg > 0, lax.rsqrt(deg), 0.0)
    norm = deg_inv_sqrt[row] * deg_inv_sqrt[col]
    # out[i] = sum_{edges j->i} norm * x[j]  =>  A_hat[i, j] += norm
    a_hat = jnp.zeros((num_padded, num_padded), jnp.float32).at[col, row].add(norm)
    return a_hat


def augment_features(x, num_padded, feat_pad):
    """[X | 1 | 0...] padded to [num_padded, feat_pad]; ones-column at index n_features."""
    n, f = x.shape
    xa = jnp.zeros((num_padded, feat_pad), jnp.float32)
    xa = xa.at[:n, :f].set(x)
    xa = xa.at[:n, f].set(1.0)
    return xa


def augment_weight(w, b, in_pad, out_pad, ones_row):
    """[W ; b ; 0...] padded to [in_pad, out_pad], bias placed at `ones_row`."""
    fi, fo = w.shape
    wa = jnp.zeros((in_pad, out_pad), jnp.float32)
    wa = wa.at[:fi, :fo].set(w)
    wa = wa.at[ones_row, :fo].set(b)
    return wa


def init_linear(key, fan_in, fan_out):
    """Deterministic torch.nn.Linear-style init: U(-1/sqrt(fan_in), 1/sqrt(fan_in))."""
    kw, kb = jax.random.split(key)
    bound = 1.0 / jnp.sqrt(jnp.float32(fan_in))
    w = jax.random.uniform(kw, (fan_in, fan_out), jnp.float32, -bound, bound)
    b = jax.random.uniform(kb, (fan_out,), jnp.float32, -bound, bound)
    return w, b


def gcn_reference(a_hat, x, w1, b1, w2, b2):
    """Pure-JAX f32 reference of the PyTorch forward (eval mode)."""
    h = jnp.maximum(a_hat @ (x @ w1 + b1), 0.0)
    z = a_hat @ (h @ w2 + b2)
    m = jnp.max(z, axis=1, keepdims=True)
    s = z - m
    return s - jnp.log(jnp.sum(jnp.exp(s), axis=1, keepdims=True))


if __name__ == "__main__":
    num_features, hidden, num_classes = 8, 16, 4

    # Synthetic graph: 50 triangles (3-cliques) chained into a ring -> 150 nodes.
    num_tri = 50
    num_nodes = 3 * num_tri
    und = []
    for t in range(num_tri):
        a, b, c = 3 * t, 3 * t + 1, 3 * t + 2
        und += [(a, b), (b, c), (c, a)]
        und.append((c, (3 * (t + 1)) % num_nodes))   # chain to next triangle
    src = [u for (u, v) in und] + [v for (u, v) in und]
    dst = [v for (u, v) in und] + [u for (u, v) in und]
    edge_index = jnp.array([src, dst], dtype=jnp.int32)

    key = jax.random.PRNGKey(0)
    kx, k1, k2 = jax.random.split(key, 3)
    x = jax.random.normal(kx, (num_nodes, num_features), jnp.float32)
    w1, b1 = init_linear(k1, num_features, hidden)
    w2, b2 = init_linear(k2, hidden, num_classes)

    # Pad node count so the grid has >= 2 row tiles and >= 2 reduction steps.
    num_padded = max(round_up(num_nodes, TILE_M), 2 * TILE_K)

    a_hat_f32 = build_normalized_adjacency(edge_index, num_nodes, num_padded)
    a_hat_bf16 = a_hat_f32.astype(jnp.bfloat16)
    x_aug = augment_features(x, num_padded, LANE).astype(jnp.bfloat16)
    w1_aug = augment_weight(w1, b1, LANE, LANE, ones_row=num_features).astype(jnp.bfloat16)
    w2_aug = augment_weight(w2, b2, LANE, LANE, ones_row=hidden).astype(jnp.bfloat16)

    out = gcn_forward(a_hat_bf16, x_aug, w1_aug, w2_aug,
                      num_nodes, hidden, num_classes)
    jax.block_until_ready(out)

    assert out.shape == (num_nodes, num_classes)
    # log_softmax rows must exp-sum to ~1
    assert jnp.allclose(jnp.sum(jnp.exp(out), axis=1), 1.0, atol=1e-4)
    # match the f32 pure-JAX reference (bf16 operands -> loose tolerance)
    ref = gcn_reference(a_hat_f32[:num_nodes, :num_nodes], x, w1, b1, w2, b2)
    assert jnp.max(jnp.abs(out - ref)) < 0.1

    print("KERNEL_OK")
</pallas_src>

<mosaic_0001>
module attributes {stable_mosaic.version = 11 : i64} {
  func.func @_gcn_layer_kernel(%arg0: i32, %arg1: i32, %arg2: memref<128x128xbf16, #tpu.memory_space<vmem>>, %arg3: memref<128x128xbf16, #tpu.memory_space<vmem>>, %arg4: memref<128x128xbf16, #tpu.memory_space<vmem>>, %arg5: memref<128x128xbf16, #tpu.memory_space<vmem>>, %arg6: memref<128x128xf32, #tpu.memory_space<vmem>>) attributes {dimension_semantics = [#tpu.dimension_semantics<parallel>, #tpu.dimension_semantics<arbitrary>], iteration_bounds = array<i64: 2, 2>, scalar_prefetch = 0 : i64, scratch_operands = 1 : i64, tpu.core_type = #tpu.core_type<tc>, window_params = [{transform_indices = @transform_0, window_bounds = array<i64: 128, 128>}, {transform_indices = @transform_1, window_bounds = array<i64: 128, 128>}, {pipeline_mode = #tpu.pipeline_mode<synchronous>, transform_indices = @transform_2, window_bounds = array<i64: 128, 128>}, {transform_indices = @transform_3, window_bounds = array<i64: 128, 128>}]} {
    %c0_i32 = arith.constant 0 : i32
    %0 = arith.cmpi eq, %arg1, %c0_i32 : i32
    %1 = arith.extui %0 : i1 to i32
    %c0_i32_0 = arith.constant 0 : i32
    %2 = arith.cmpi ne, %1, %c0_i32_0 : i32
    scf.if %2 {
      %cst_9 = arith.constant 0.000000e+00 : f32
      %12 = vector.broadcast %cst_9 : f32 to vector<128x128xf32>
      %c0_10 = arith.constant 0 : index
      %c0_11 = arith.constant 0 : index
      %13 = vector.load %arg6[%c0_10, %c0_11] : memref<128x128xf32, #tpu.memory_space<vmem>>, vector<128x128xf32>
      tpu.vector_store %arg6[%c0_10, %c0_11], %12 {strides = array<i32>} : memref<128x128xf32, #tpu.memory_space<vmem>>, vector<128x128xf32>,
    } else {
    }
    %c0 = arith.constant 0 : index
    %c0_1 = arith.constant 0 : index
    %3 = vector.load %arg6[%c0, %c0_1] : memref<128x128xf32, #tpu.memory_space<vmem>>, vector<128x128xf32>
    %c0_2 = arith.constant 0 : index
    %c0_3 = arith.constant 0 : index
    %4 = vector.load %arg2[%c0_2, %c0_3] : memref<128x128xbf16, #tpu.memory_space<vmem>>, vector<128x128xbf16>
    %c0_4 = arith.constant 0 : index
    %c0_5 = arith.constant 0 : index
    %5 = vector.load %arg3[%c0_4, %c0_5] : memref<128x128xbf16, #tpu.memory_space<vmem>>, vector<128x128xbf16>
    %cst = arith.constant dense<0.000000e+00> : vector<128x128xf32>
    %6 = tpu.matmul %4, %5, %cst {dimension_numbers = #tpu.dot_dimension_numbers<[1], [0], [0], [1], [0, 0, 1, 1], [], []>} : vector<128x128xbf16>, vector<128x128xbf16>, vector<128x128xf32> -> vector<128x128xf32>
    %7 = arith.addf %3, %6 : vector<128x128xf32>
    %c0_6 = arith.constant 0 : index
    %c0_7 = arith.constant 0 : index
    %8 = vector.load %arg6[%c0_6, %c0_7] : memref<128x128xf32, #tpu.memory_space<vmem>>, vector<128x128xf32>
    tpu.vector_store %arg6[%c0_6, %c0_7], %7 {strides = array<i32>} : memref<128x128xf32, #tpu.memory_space<vmem>>, vector<128x128xf32>,
    %c1_i32 = arith.constant 1 : i32
    %9 = arith.cmpi eq, %arg1, %c1_i32 : i32
    %10 = arith.extui %9 : i1 to i32
    %c0_i32_8 = arith.constant 0 : i32
    %11 = arith.cmpi ne, %10, %c0_i32_8 : i32
    scf.if %11 {
      %c0_9 = arith.constant 0 : index
      %c0_10 = arith.constant 0 : index
      %12 = vector.load %arg6[%c0_9, %c0_10] : memref<128x128xf32, #tpu.memory_space<vmem>>, vector<128x128xf32>
      %13 = arith.truncf %12 : vector<128x128xf32> to vector<128x128xbf16>
      %c0_11 = arith.constant 0 : index
      %c0_12 = arith.constant 0 : index
      %14 = vector.load %arg4[%c0_11, %c0_12] : memref<128x128xbf16, #tpu.memory_space<vmem>>, vector<128x128xbf16>
      %cst_13 = arith.constant dense<0.000000e+00> : vector<128x128xf32>
      %15 = tpu.matmul %13, %14, %cst_13 {dimension_numbers = #tpu.dot_dimension_numbers<[1], [0], [0], [1], [0, 0, 1, 1], [], []>} : vector<128x128xbf16>, vector<128x128xbf16>, vector<128x128xf32> -> vector<128x128xf32>
      %16 = tpu.iota {dimensions = array<i32: 1>} : vector<128x128xi32>
      %cst_14 = arith.constant 0.000000e+00 : f32
      %17 = vector.broadcast %cst_14 : f32 to vector<128x128xf32>
      %18 = arith.maximumf %15, %17 : vector<128x128xf32>
      %c16_i32 = arith.constant 16 : i32
      %19 = vector.broadcast %c16_i32 : i32 to vector<128x128xi32>
      %20 = arith.cmpi eq, %16, %19 : vector<128x128xi32>
      %cst_15 = arith.constant 1.000000e+00 : f32
      %21 = vector.broadcast %cst_15 : f32 to vector<128x128xf32>
      %22 = arith.select %20, %21, %18 : vector<128x128xi1>, vector<128x128xf32>
      %23 = arith.truncf %22 : vector<128x128xf32> to vector<128x128xbf16>
      %c0_16 = arith.constant 0 : index
      %c0_17 = arith.constant 0 : index
      %24 = vector.load %arg5[%c0_16, %c0_17] : memref<128x128xbf16, #tpu.memory_space<vmem>>, vector<128x128xbf16>
      tpu.vector_store %arg5[%c0_16, %c0_17], %23 {strides = array<i32>} : memref<128x128xbf16, #tpu.memory_space<vmem>>, vector<128x128xbf16>,
    } else {
    }
    return
  }
  func.func @transform_0(%arg0: i32, %arg1: i32) -> (i32, i32) {
    %c0_i32 = arith.constant 0 : i32
    return %arg0, %arg1 : i32, i32
  }
  func.func @transform_1(%arg0: i32, %arg1: i32) -> (i32, i32) {
    %c0_i32 = arith.constant 0 : i32
    %c0_i32_0 = arith.constant 0 : i32
    return %arg1, %c0_i32 : i32, i32
  }
  func.func @transform_2(%arg0: i32, %arg1: i32) -> (i32, i32) {
    %c0_i32 = arith.constant 0 : i32
    %c0_i32_0 = arith.constant 0 : i32
    %c0_i32_1 = arith.constant 0 : i32
    return %c0_i32, %c0_i32_0 : i32, i32
  }
  func.func @transform_3(%arg0: i32, %arg1: i32) -> (i32, i32) {
    %c0_i32 = arith.constant 0 : i32
    %c0_i32_0 = arith.constant 0 : i32
    return %arg0, %c0_i32 : i32, i32
  }
}

</mosaic_0001>

<bundles_post_ra>
// kernel: tpu_custom_call.1
= control target key start
LH: loop header
LB: loop body
LE: loop exit
PB: predicated region body
PF: predicated region fallthrough
CT: control target
= control target key end

     0   :  { %s2124_s0 = inlined_call_operand.hbm [shape: bf16[256,256], index: 0, kind: input, shape index: {}]   ;;  %s2125_s1 = inlined_call_operand.hbm [shape: bf16[256,128], index: 1, kind: input, shape index: {}]   ;;  %s2126_s2 = inlined_call_operand.hbm [shape: bf16[128,128], index: 2, kind: input, shape index: {}]   ;;  %s2127_s3 = inlined_call_operand.hbm [shape: bf16[256,128], index: 3, kind: output, shape index: {}]  }
   0x1   :  { %2151 = sst [smem:[#allocation23_spill]] %s2126_s2 }
   0x2   :  { %2152 = sst [smem:[#allocation24_spill]] %s2127_s3 }
   0x3   :  { %8 = vsyncpa [#allocation4], 0 }
   0x4   :  { %10 = vsyncpa [#allocation4 + $0x1], 0 }
   0x5   :  { %11 = vsyncpa [#allocation7], 0 }
   0x6   :  { %13 = vsyncpa [#allocation7 + $0x1], 0 }
   0x7   :  { %14 = vsyncpa [#allocation5], 0 }
   0x8   :  { %16 = vsyncpa [#allocation5 + $0x1], 0  ;;  %s1696_s12 = smov 0   ;;  %s1698_s13 = smov 0  }
   0x9   :  { %s1700_s14 = smov 0   ;;  %s1702_s15 = smov 0  }
   0xa   :  { %s1704_s16 = smov 0   ;;  %s1706_s17 = smov 0  }
   0xb   :  { %s1708_s18 = smov 0   ;;  %s1710_s19 = smov 0  }
   0xc   :  { %s1712_s20 = smov 0   ;;  %s1714_s21 = smov 0  }
   0xd   :  { %s1716_s22 = smov 0   ;;  %s1718_s23 = smov 0  }
   0xe   :  { %s1720_s24 = smov 0   ;;  %s1722_s25 = smov 0  }
   0xf LB: > { %2153 = sst [smem:[#allocation14_spill]] %s1612_s12  ;;  %s1763_s26 = sadd.s32 4294967295, %s1664_s25   ;;  %s1664_s25 = sphi %s1722_s25, %s22_s25   ;;  %s1660_s24 = sphi %s1720_s24, %s2212_s24   ;;  %s1656_s23 = sphi %s1718_s23, %s2211_s23   ;;  %s1652_s22 = sphi %s1716_s22, %s2210_s22   ;;  %s1648_s21 = sphi %s1714_s21, %s2209_s21   ;;  %s1644_s20 = sphi %s1712_s20, %s2208_s20   ;;  %s1640_s19 = sphi %s1710_s19, %s2207_s19   ;;  %s1636_s18 = sphi %s1708_s18, %s2206_s18   ;;  %s1632_s17 = sphi %s1706_s17, %s2205_s17   ;;  %s1628_s16 = sphi %s1704_s16, %s2204_s16   ;;  %s1624_s15 = sphi %s1702_s15, %s2203_s15   ;;  %s1620_s14 = sphi %s1700_s14, %s2202_s14   ;;  %s1616_s13 = sphi %s1698_s13, %s2201_s13   ;;  %s1612_s12 = sphi %s1696_s12, %s2200_s12  }
  0x10   : > { %2154 = sst [smem:[#allocation15_spill]] %s1616_s13  ;;  %s993_s27 = sadd.s32 4294967294, %s1664_s25  }
  0x11   : > { %2155 = sst [smem:[#allocation16_spill]] %s1648_s21  ;;  %p56_p0 = scmp.ne.s32.totalorder %s1640_s19, %s1636_s18 }
  0x12   : > { %2156 = sst [smem:[#allocation17_spill]] %s1652_s22  ;;  %p2129_p1 = scmp.eq.s32.totalorder %s1763_s26, 0 }
  0x13   : > { %2157 = sst [smem:[#allocation18_spill]] %s1763_s26  ;;  %p82_p2 = scmp.ne.s32.totalorder %s1628_s16, %s1624_s15 }
  0x14   : > { %p1772_p3 = por %p2129_p1, %p56_p0  ;;  %p126_p4 = scmp.ne.s32.totalorder %s1620_s14, %s1616_s13 }
  0x15   : > { %p1780_p5 = por %p82_p2, %p2129_p1  ;;  %p127_p6 = scmp.eq.s32.totalorder %s1763_s26, 3 }
  0x16   : > { %s2158_s29 = scalar_select %p1772_p3, 1, 0 }
  0x17   : > { %s2159_s30 = scalar_select %p1780_p5, 1, 0 }
  0x18   : > { %p132_p7 = scmp.ne.s32.totalorder %s1616_s13, %s1612_s12  ;;  %p133_p8 = scmp.eq.s32.totalorder %s993_s27, 3 }
  0x19   : > { %2160 = sst [smem:[#allocation19_spill]] %s2159_s30  ;;  %p1787_p9 = por %p127_p6, %p126_p4 }
  0x1a   : > { %p994_p10 = scmp.ge.s32.totalorder %s1664_s25, 1  ;;  %p1792_p11 = por %p133_p8, %p132_p7 }
  0x1b   : > { %s2161_s4 = scalar_select %p1787_p9, 1, 0 }
  0x1c   : > { %s2163_s5 = scalar_select %p1792_p11, 1, 0 }
  0x1d   : > { %2162 = sst [smem:[#allocation20_spill]] %s2161_s4  ;;  %p140_p12 = scmp.lt.s32.totalorder %s1664_s25, 5 }
  0x1e   : > { %2164 = sst [smem:[#allocation21_spill]] %s2163_s5  ;;  %s1666_s7 = smov [#allocation8]  }
  0x1f   : > { %p1797_p13 = pnand %p994_p10, %p140_p12  ;;  %s152_s8 = sshll.u32 %s1666_s7, 4  ;;  %s153_s8 = int_to_ptr.vmem [resolvable:$true] %s152_s8 }
  0x20   : > { %s2167_s2 = sld [smem:[#allocation23_spill]] }
  0x21   : > { %s2165_s6 = scalar_select %p1797_p13, 1, 0 }
  0x22   : > { %p1260_p0 = pneg %p1797_p13 }
  0x24   : > { %p1805_p2 = pnand %p1260_p0, %p2129_p1 }
  0x26   : > { %s1422_s15 = scalar_lea.hbm %s2167_s2, 1024  ;;  %p1424_p6 = pneg %p1805_p2 }
  0x27   : > { %p1423_p4 = scmp.ne.s32.totalorder %s2167_s2, %s1422_s15  ;;  %p1429_p10 = scmp.lt.u32.totalorder %s1422_s15, %s2167_s2 }
  0x29   : > { %p1425_p7 = pnand %p1424_p6, %p1423_p4 }
  0x2b   : > { %p1426_p8 = pneg %p1425_p7 }
  0x2d   : > { %p1431_p12 = pnand %p1429_p10, %p1426_p8 }
  0x2f   : > { %1434 = shalt.err (!%p1431_p12)
}
  0x30   : > { %s1435_s5 = scalar_lea.vmem %s153_s8, 1024  ;;  %p1443_p9 = scmp.lt.s32.totalorder %s153_s8, %s153_s8 }
  0x31   : > { %p1436_p0 = scmp.ne.s32.totalorder %s153_s8, %s1435_s5  ;;  %p1444_p5 = scmp.lt.s32.totalorder %s1435_s5, %s1435_s5 }
  0x33   : > { %p1438_p1 = pnand %p1436_p0, %p1424_p6  ;;  %p1445_p3 = por %p1444_p5, %p1443_p9 }
  0x35   : > { %p1439_p11 = pneg %p1438_p1 }
  0x37   : > { %p1446_p13 = pnand %p1445_p3, %p1439_p11 }
  0x39   : > { %1449 = shalt.err (!%p1446_p13)
}
  0x3a   : > { %s2134_s10 = smov 64   ;;  %s2136_s28 = smov 4  }
  0x3b   : > { %1263 = dma.hbm_to_vmem [thread:$0]  (!%p1805_p2), %s2167_s2, 1024, %s153_s8, [#allocation7], %s2134_s10, %s2134_s10, %s2136_s28  }
  0x3c   : > { %s31_s15 = sadd.s32 1, %s1656_s23  ;;  %s34_s18 = sadd.s32 1, %s1660_s24 }
  0x3d   : > { %p32_p1 = scmp.ge.s32.totalorder %s31_s15, 2  ;;  %s43_s27 = sadd.s32 1, %s1644_s20 }
  0x3e   : > { %p50_p3 = scmp.ne.s32.totalorder %s1644_s20, %s1640_s19  ;;  %p2150_p5 = scmp.eq.s32.totalorder %s1664_s25, 0 }
  0x3f   : > { %s2214_s15 = smov (%p32_p1, %s31_s15), 0  ;;  %s2216_s18 = smov (!%p32_p1, %s34_s18), %s1660_s24 }
  0x40   : > { %2168 = sst [smem:[#allocation22_spill]] %s2214_s15  ;;  %s1838_s9 = ssub.s32 %s1656_s23, %s2214_s15 }
  0x41   : > { %p36_p9 = scmp.ge.s32.totalorder %s2216_s18, 2  ;;  %p67_p11 = scmp.eq.s32.totalorder %s1838_s9, 0 }
  0x42   : > { %p1844_p13 = por %p2150_p5, %p50_p3  ;;  %p2149_p2 = scmp.lt.s32.totalorder %s1664_s25, 4 }
  0x43   : > { %s2218_s18 = smov (%p36_p9, %s2216_s18), 0  ;;  %s166_s7 = sand.u32 1, %s1644_s20  }
  0x44   : > { %s1056_s5 = sshll.u32 %s1660_s24, 5  ;;  %s38_s11 = ssub.s32 %s1660_s24, %s2218_s18 }
  0x45   : > { %s40_s10 = sor.u32 %s1838_s9, %s38_s11  ;;  %p114_p4 = scmp.eq.s32.totalorder %s38_s11, 0 }
  0x46   : > { %p41_p6 = scmp.eq.s32.totalorder %s40_s10, 0  ;;  %s997_s28 = sshll.u32 %s166_s7, 6 }
  0x47   : > { %s2170_s2 = sadd.s32 1, %s1620_s14  ;;  %s176_s3 = sadd.s32 %s1656_s23, %s1056_s5 }
  0x48   : > { %s1859_s15 = scalar_select %p114_p4, %s1620_s14, %s2170_s2  }
  0x49   : > { %s1862_s12 = scalar_select %p41_p6, %s1644_s20, %s43_s27  }
  0x4a   : > { %s1000_s4 = sshll.u32 %s176_s3, 6  ;;  %s170_s22 = scalar_lea.vmem [#allocation3], %s997_s28 }
  0x4b   : > { %s179_s21 = sshll.u32 %s170_s22, 4  ;;  %s1868_s26 = scalar_lea.hbm %s2124_s0, %s1000_s4  ;;  %s1870_s21 = int_to_ptr.vmem [resolvable:$true] %s179_s21 }
  0x4c   : > { %p1876_p7 = pnand %p2149_p2, %p1844_p13  ;;  %s189_s3 = sand.u32 1, %s1664_s25  }
  0x4d   : > { %s1881_s22 = scalar_lea.sflag [#allocation4], %s166_s7  ;;  %s1450_s13 = scalar_lea.hbm %s1868_s26, 1024 }
  0x4e   : > { %p1451_p8 = scmp.ne.s32.totalorder %s1868_s26, %s1450_s13  ;;  %p1452_p10 = pneg %p1876_p7 }
  0x4f   : > { %s1455_s10 = scalar_lea.hbm %s2124_s0, 4096  ;;  %p1456_p1 = scmp.lt.u32.totalorder %s1868_s26, %s2124_s0 }
  0x50   : > { %p1453_p12 = pnand %p1452_p10, %p1451_p8  ;;  %p1457_p3 = scmp.lt.u32.totalorder %s1455_s10, %s1450_s13 }
  0x51   : > { %p1459_p13 = scmp.lt.u32.totalorder %s1450_s13, %s1868_s26 }
  0x52   : > { %p1454_p0 = pneg %p1453_p12  ;;  %p1458_p9 = por %p1457_p3, %p1456_p1 }
  0x54   : > { %p1460_p4 = por %p1459_p13, %p1458_p9 }
  0x56   : > { %p1461_p6 = pnand %p1460_p4, %p1454_p0 }
  0x58   : > { %1464 = shalt.err (!%p1461_p6)
}
  0x59   : > { %s1465_s8 = scalar_lea.vmem %s1870_s21, 1024  ;;  %s1669_s7 = smov [#allocation3]  }
  0x5a   : > { %p1466_p8 = scmp.ne.s32.totalorder %s1870_s21, %s1465_s8  ;;  %s1470_s5 = sshll.u32 %s1669_s7, 4  ;;  %s1471_s5 = int_to_ptr.vmem [resolvable:$false] %s1470_s5 }
  0x5b   : > { %s1472_s11 = scalar_lea.vmem %s1471_s5, 2048  ;;  %p1473_p5 = scmp.lt.s32.totalorder %s1870_s21, %s1471_s5 }
  0x5c   : > { %p1468_p12 = pnand %p1466_p8, %p1452_p10  ;;  %p1474_p1 = scmp.lt.s32.totalorder %s1472_s11, %s1465_s8 }
  0x5e   : > { %p1469_p2 = pneg %p1468_p12  ;;  %p1475_p3 = por %p1474_p1, %p1473_p5 }
  0x60   : > { %p1476_p9 = pnand %p1475_p3, %p1469_p2 }
  0x62   : > { %1479 = shalt.err (!%p1476_p9)
}
  0x63   : > { %s1670_s13 = smov 128   ;;  %s2172_s30 = smov 4  }
  0x64   : > { %s2173_s4 = smov 64   ;;  %s69_s10 = sadd.s32 1, %s1632_s17 }
  0x65   : > { %1267 = dma.hbm_to_vmem [thread:$0]  (!%p1876_p7), %s1868_s26, 1024, %s1870_s21, %s1881_s22, %s1670_s13, %s2173_s4, %s2172_s30  }
  0x66   : > { %p76_p5 = scmp.ne.s32.totalorder %s1632_s17, %s1628_s16  ;;  %p2174_p2 = scmp.eq.s32.totalorder %s1664_s25, 0 }
  0x67   : > { %s1917_s2 = scalar_select %p67_p11, %s1632_s17, %s69_s10  }
  0x68   : > { %p78_p10 = por %p76_p5, %p2174_p2  ;;  %s191_s28 = sand.u32 1, %s1632_s17  }
  0x69   : > { %s1057_s27 = sshll.u32 %s1656_s23, 10  ;;  %s1001_s8 = sshll.u32 %s191_s28, 6 }
  0x6a   : > { %s1926_s11 = scalar_lea.hbm %s2125_s1, %s1057_s27  ;;  %p2175_p0 = scmp.lt.s32.totalorder %s1664_s25, 4 }
  0x6b   : > { %s193_s26 = scalar_lea.vmem [#allocation6], %s1001_s8  ;;  %s1938_s22 = scalar_lea.sflag [#allocation7], %s189_s3 }
  0x6c   : > { %p1930_p7 = pnand %p2175_p0, %p78_p10  ;;  %s200_s9 = sshll.u32 %s193_s26, 4  ;;  %s1934_s9 = int_to_ptr.vmem [resolvable:$true] %s200_s9 }
  0x6d   : > { %s1480_s13 = scalar_lea.hbm %s1926_s11, 1024  ;;  %s1485_s27 = scalar_lea.hbm %s2125_s1, 2048 }
  0x6e   : > { %p1481_p11 = scmp.ne.s32.totalorder %s1926_s11, %s1480_s13  ;;  %p1482_p13 = pneg %p1930_p7 }
  0x6f   : > { %p1486_p8 = scmp.lt.u32.totalorder %s1926_s11, %s2125_s1  ;;  %p1487_p12 = scmp.lt.u32.totalorder %s1485_s27, %s1480_s13 }
  0x70   : > { %p1483_p4 = pnand %p1482_p13, %p1481_p11  ;;  %p1489_p3 = scmp.lt.u32.totalorder %s1480_s13, %s1926_s11 }
  0x71   : > { %p1488_p1 = por %p1487_p12, %p1486_p8 }
  0x72   : > { %p1484_p6 = pneg %p1483_p4 }
  0x73   : > { %p1490_p9 = por %p1489_p3, %p1488_p1 }
  0x75   : > { %p1491_p5 = pnand %p1490_p9, %p1484_p6 }
  0x77   : > { %1494 = shalt.err (!%p1491_p5)
}
  0x78   : > { %s1495_s3 = scalar_lea.vmem %s1934_s9, 1024  ;;  %s1671_s5 = smov [#allocation6]  }
  0x79   : > { %p1496_p2 = scmp.ne.s32.totalorder %s1934_s9, %s1495_s3  ;;  %s1500_s26 = sshll.u32 %s1671_s5, 4  ;;  %s1501_s26 = int_to_ptr.vmem [resolvable:$false] %s1500_s26 }
  0x7a   : > { %s1502_s10 = scalar_lea.vmem %s1501_s26, 2048  ;;  %p1503_p11 = scmp.lt.s32.totalorder %s1934_s9, %s1501_s26 }
  0x7b   : > { %p1498_p10 = pnand %p1496_p2, %p1482_p13  ;;  %p1504_p4 = scmp.lt.s32.totalorder %s1502_s10, %s1495_s3 }
  0x7d   : > { %p1499_p0 = pneg %p1498_p10  ;;  %p1505_p8 = por %p1504_p4, %p1503_p11 }
  0x7f   : > { %p1506_p12 = pnand %p1505_p8, %p1499_p0 }
  0x81   : > { %1509 = shalt.err (!%p1506_p12)
}
  0x82   : > { %1270 = dma.hbm_to_vmem [thread:$0]  (!%p1930_p7), %s1926_s11, 1024, %s1934_s9, %s1938_s22, %s2173_s4, %s2173_s4, %s2172_s30  }
  0x83   : > { %p2177_p13 = scmp.ne.s32.totalorder %s2165_s6, 0 }
  0x84   : > { %s214_s13 = sand.u32 (!%p2177_p13), 1, %s1640_s19   ;;  %p2178_p6 = scmp.ne.s32.totalorder (!%p2177_p13), %s2158_s29, 0 }
  0x85   : > { %212 = sbr.rel (%p2177_p13) target bundleno = 688 (0x2b0), region = 32  ;;  %s1005_s28 = sshll.u32 (!%p2177_p13), %s214_s13, 6 }
  0x86   : > { %s215_s27 = scalar_lea.sflag (!%p2177_p13), [#allocation4], %s214_s13  ;;  %s1972_s7 = scalar_lea.vmem (!%p2177_p13), [#allocation3], %s1005_s28 }
  0x8c   : > { %1595 = dma.done.wait (%p2178_p6), %s215_s27, 1024  }
  0x8d   : > { %1597 = vsyncadd (%p2178_p6), %s215_s27, 4294966272  ;;  %s2179_s21 = sld [smem:[#allocation18_spill]]  ;;  %s2180_s8 = sld [smem:[#allocation19_spill]] }
  0x8e   : > { %s225_s30 = sand.u32 1, %s1628_s16  }
  0x8f   : > { %s1006_s4 = sshll.u32 %s225_s30, 6 }
  0x90   : > { %s1980_s11 = scalar_lea.vmem [#allocation6], %s1006_s4 }
  0x93   : > { %s223_s3 = sand.u32 1, %s2179_s21   ;;  %p2181_p7 = scmp.ne.s32.totalorder %s2180_s8, 0 }
  0x94   : > { %s224_s6 = scalar_lea.sflag [#allocation7], %s223_s3 }
  0x95   : > { %1599 = dma.done.wait (%p2181_p7), %s224_s6, 1024  }
  0x96   : > { %1601 = vsyncadd (%p2181_p7), %s224_s6, 4294966272  ;;  %p2182_p1 = scmp.eq.s32.totalorder %s2179_s21, 0 }
  0x98   : > { %1603 = dma.done.wait (%p2182_p1), [#allocation7], 1024   ;;  %p2183_p3 = pmov %p2182_p1 }
  0x99   : > { %s2184_s29 = sld [smem:[#allocation15_spill]]  ;;  %s2185_s26 = sld [smem:[#allocation16_spill]] }
  0x9a   : > { %1605 = vsyncadd (%p2183_p3), [#allocation7], 4294966272 }
  0x9f   : > { %s256_s9 = sand.u32 1, %s2184_s29   ;;  %p1009_p9 = scmp.ne.s32.totalorder %s2185_s26, 0 }
  0xa0   : > { %s1008_s22 = sshll.u32 %s256_s9, 6  ;;  %v1672_v0 = vmov (!%p1009_p9), 0.0  }
  0xa1   : > { %s1993_s5 = scalar_lea.vmem [#allocation9], %s1008_s22  ;;  %266 = sbr.rel (%p1009_p9) target bundleno = 169 (0xa9), region = 48  ;;  %267 = vst [vmem:[#allocation2] sm:$0xff] (!%p1009_p9), %v1672_v0  ;;  %268 = vst [vmem:[#allocation2 + $0x8] sm:$0xff] (!%p1009_p9), %v1672_v0 }
  0xa2   : > { %269 = vst [vmem:[#allocation2 + $0x10] sm:$0xff] (!%p1009_p9), %v1672_v0  ;;  %270 = vst [vmem:[#allocation2 + $0x18] sm:$0xff] (!%p1009_p9), %v1672_v0 }
  0xa3   : > { %271 = vst [vmem:[#allocation2 + $0x20] sm:$0xff] (!%p1009_p9), %v1672_v0  ;;  %272 = vst [vmem:[#allocation2 + $0x28] sm:$0xff] (!%p1009_p9), %v1672_v0 }
  0xa4   : > { %273 = vst [vmem:[#allocation2 + $0x30] sm:$0xff] (!%p1009_p9), %v1672_v0  ;;  %274 = vst [vmem:[#allocation2 + $0x38] sm:$0xff] (!%p1009_p9), %v1672_v0 }
  0xa5   : > { %275 = vst [vmem:[#allocation2 + $0x40] sm:$0xff] (!%p1009_p9), %v1672_v0  ;;  %276 = vst [vmem:[#allocation2 + $0x48] sm:$0xff] (!%p1009_p9), %v1672_v0 }
  0xa6   : > { %277 = vst [vmem:[#allocation2 + $0x50] sm:$0xff] (!%p1009_p9), %v1672_v0  ;;  %278 = vst [vmem:[#allocation2 + $0x58] sm:$0xff] (!%p1009_p9), %v1672_v0 }
  0xa7   : > { %279 = vst [vmem:[#allocation2 + $0x60] sm:$0xff] (!%p1009_p9), %v1672_v0  ;;  %280 = vst [vmem:[#allocation2 + $0x68] sm:$0xff] (!%p1009_p9), %v1672_v0 }
  0xa8   : > { %281 = vst [vmem:[#allocation2 + $0x70] sm:$0xff] %v1672_v0  ;;  %282 = vst [vmem:[#allocation2 + $0x78] sm:$0xff] %v1672_v0 }
  0xa9 PF: > { %v1398_v1 = vld [vmem:[%s1980_s11] sm:$0xff]   ;;  %v1399_v2 = vld [vmem:[%s1980_s11 + $0x8] sm:$0xff]   ;;  %v1400_v3 = vld [vmem:[%s1980_s11 + $0x10] sm:$0xff]   ;;  %s2186_s10 = sld [smem:[#allocation16_spill]] }
  0xaa   : > { %1154 = vmatprep.subr.bf16.mxu0 %v1398_v1  ;;  %1218 = vmatprep.subr.bf16.mxu1 %v1398_v1  ;;  %v1401_v4 = vld [vmem:[%s1980_s11 + $0x18] sm:$0xff]   ;;  %v1406_v5 = vld [vmem:[%s1972_s7] sm:$0xff]   ;;  %v1403_v8 = vld [vmem:[%s1980_s11 + $0x28] sm:$0xff]  }
  0xab   : > { %1155 = vmatpush3.bf16.msra.mxu0 %v1398_v1  ;;  %1226 = vmatpush3.bf16.msra.mxu1 %v1398_v1  ;;  %v1407_v6 = vld [vmem:[%s1972_s7 + $0x20] sm:$0xff]   ;;  %v1404_v9 = vld [vmem:[%s1980_s11 + $0x30] sm:$0xff]   ;;  %v1405_v10 = vld [vmem:[%s1980_s11 + $0x38] sm:$0xff]  }
  0xac   : > { %1156 = vmatprep.subr.bf16.mxu0 %v1399_v2  ;;  %1219 = vmatprep.subr.bf16.mxu1 %v1399_v2  ;;  %v1402_v7 = vld [vmem:[%s1980_s11 + $0x20] sm:$0xff]   ;;  %v1408_v11 = vld [vmem:[%s1972_s7 + $0x8] sm:$0xff]   ;;  %v1410_v13 = vld [vmem:[%s1972_s7 + $0x10] sm:$0xff]  }
  0xad   : > { %1170 = vmatprep.mubr.bf16.mxu0 %v1406_v5  ;;  %1178 = vmatprep.mubr.bf16.mxu1 %v1407_v6  ;;  %v1409_v12 = vld [vmem:[%s1972_s7 + $0x28] sm:$0xff]   ;;  %v1411_v14 = vld [vmem:[%s1972_s7 + $0x30] sm:$0xff]   ;;  %v1412_v15 = vld [vmem:[%s1972_s7 + $0x18] sm:$0xff]  }
  0xae   : > { %v1413_v16 = vld [vmem:[%s1972_s7 + $0x38] sm:$0xff]   ;;  %v285_v17 = vld [vmem:[#allocation2 + $0x10] sm:$0xff]  ;;  %v283_v19 = vld [vmem:[#allocation2] sm:$0xff] }
  0xaf   : > { %1157 = vmatpush3.bf16.msra.mxu0 %v1399_v2  ;;  %1227 = vmatpush3.bf16.msra.mxu1 %v1399_v2  ;;  %v293_v18 = vld [vmem:[#allocation2 + $0x50] sm:$0xff]  ;;  %v291_v20 = vld [vmem:[#allocation2 + $0x40] sm:$0xff]  ;;  %v286_v23 = vld [vmem:[#allocation2 + $0x18] sm:$0xff]  ;;  %p1026_p5 = scmp.ne.s32.totalorder %s2186_s10, 1 }
  0xb0   : > { %1158 = vmatprep.subr.bf16.mxu0 %v1400_v3  ;;  %1220 = vmatprep.subr.bf16.mxu1 %v1400_v3  ;;  %v294_v24 = vld [vmem:[#allocation2 + $0x58] sm:$0xff]  ;;  %v284_v29 = vld [vmem:[#allocation2 + $0x8] sm:$0xff]  ;;  %v289_v41 = vld [vmem:[#allocation2 + $0x30] sm:$0xff] }
  0xb1   : > { %v292_v30 = vld [vmem:[#allocation2 + $0x48] sm:$0xff]  ;;  %v297_v42 = vld [vmem:[#allocation2 + $0x70] sm:$0xff]  ;;  %v287_v43 = vld [vmem:[#allocation2 + $0x20] sm:$0xff] }
  0xb2   : > { %v295_v44 = vld [vmem:[#allocation2 + $0x60] sm:$0xff]  ;;  %v290_v47 = vld [vmem:[#allocation2 + $0x38] sm:$0xff]  ;;  %v288_v53 = vld [vmem:[#allocation2 + $0x28] sm:$0xff] }
  0xb3   : > { %1159 = vmatpush3.bf16.msra.mxu0 %v1400_v3  ;;  %1228 = vmatpush3.bf16.msra.mxu1 %v1400_v3  ;;  %v298_v48 = vld [vmem:[#allocation2 + $0x78] sm:$0xff]  ;;  %v296_v54 = vld [vmem:[#allocation2 + $0x68] sm:$0xff]  ;;  %v1414_v1 = vld [vmem:[#allocation8] sm:$0xff] (!%p1026_p5)  }
  0xb4   : > { %1160 = vmatprep.subr.bf16.mxu0 %v1401_v4  ;;  %1221 = vmatprep.subr.bf16.mxu1 %v1401_v4  ;;  %v1415_v2 = vld [vmem:[#allocation8 + $0x8] sm:$0xff] (!%p1026_p5)   ;;  %v1416_v3 = vld [vmem:[#allocation8 + $0x10] sm:$0xff] (!%p1026_p5)  }
  0xb7   : > { %1161 = vmatpush3.bf16.msra.mxu0 %v1401_v4  ;;  %1229 = vmatpush3.bf16.msra.mxu1 %v1401_v4  ;;  %v1417_v4 = vld [vmem:[#allocation8 + $0x18] sm:$0xff] (!%p1026_p5)  }
  0xb8   : > { %1162 = vmatprep.subr.bf16.mxu0 %v1402_v7  ;;  %1222 = vmatprep.subr.bf16.mxu1 %v1402_v7 }
  0xbb   : > { %1163 = vmatpush3.bf16.msra.mxu0 %v1402_v7  ;;  %1230 = vmatpush3.bf16.msra.mxu1 %v1402_v7 }
  0xbc   : > { %1164 = vmatprep.subr.bf16.mxu0 %v1403_v8  ;;  %1223 = vmatprep.subr.bf16.mxu1 %v1403_v8 }
  0xbf   : > { %1165 = vmatpush3.bf16.msra.mxu0 %v1403_v8  ;;  %1231 = vmatpush3.bf16.msra.mxu1 %v1403_v8 }
  0xc0   : > { %1166 = vmatprep.subr.bf16.mxu0 %v1404_v9  ;;  %1224 = vmatprep.subr.bf16.mxu1 %v1404_v9 }
  0xc3   : > { %1167 = vmatpush3.bf16.msra.mxu0 %v1404_v9  ;;  %1232 = vmatpush3.bf16.msra.mxu1 %v1404_v9 }
  0xc4   : > { %1168 = vmatprep.subr.bf16.mxu0 %v1405_v10  ;;  %1225 = vmatprep.subr.bf16.mxu1 %v1405_v10 }
  0xc7   : > { %1169 = vmatpush3.bf16.msra.mxu0 %v1405_v10  ;;  %1233 = vmatpush3.bf16.msra.mxu1 %v1405_v10 }
  0xc8   : > { %1186 = vmatprep.subr.bf16.mxu0 (!%p1026_p5), %v1414_v1  ;;  %1234 = vmatprep.subr.bf16.mxu1 (!%p1026_p5), %v1414_v1 }
  0xca   : > { %1171 = vmatmul.mubr.bf16.vlgmr.msra.gmra.mrb[0].mxu0 %v1408_v11  ;;  %1179 = vmatmul.mubr.bf16.vlgmr.msra.gmra.mrb[0].mxu1 %v1409_v12  ;;  %v1418_v11 = vld [vmem:[#allocation8 + $0x20] sm:$0xff] (!%p1026_p5)   ;;  %v1419_v12 = vld [vmem:[#allocation8 + $0x28] sm:$0xff] (!%p1026_p5)  }
  0xcb   : > { %1174 = vmatprep.mubr.bf16.mxu0 %v1410_v13  ;;  %1182 = vmatprep.mubr.bf16.mxu1 %v1411_v14  ;;  %v1420_v13 = vld [vmem:[#allocation8 + $0x30] sm:$0xff] (!%p1026_p5)   ;;  %v1421_v14 = vld [vmem:[#allocation8 + $0x38] sm:$0xff] (!%p1026_p5)  }
  0xcc   : > { %1187 = vmatpush3.bf16.msra.mxu0 (!%p1026_p5), %v1414_v1  ;;  %1242 = vmatpush3.bf16.msra.mxu1 (!%p1026_p5), %v1414_v1 }
  0xcd   : > { %1188 = vmatprep.subr.bf16.mxu0 (!%p1026_p5), %v1415_v2  ;;  %1235 = vmatprep.subr.bf16.mxu1 (!%p1026_p5), %v1415_v2 }
  0xd0   : > { %1189 = vmatpush3.bf16.msra.mxu0 (!%p1026_p5), %v1415_v2  ;;  %1243 = vmatpush3.bf16.msra.mxu1 (!%p1026_p5), %v1415_v2 }
  0xd1   : > { %1190 = vmatprep.subr.bf16.mxu0 (!%p1026_p5), %v1416_v3  ;;  %1236 = vmatprep.subr.bf16.mxu1 (!%p1026_p5), %v1416_v3 }
  0xd2   : > { %1175 = vmatmul.mubr.bf16.gmra.mrb[4].mxu0 %v1412_v15  ;;  %1183 = vmatmul.mubr.bf16.gmra.mrb[4].mxu1 %v1413_v16 }
  0xd4   : > { %1191 = vmatpush3.bf16.msra.mxu0 (!%p1026_p5), %v1416_v3  ;;  %1244 = vmatpush3.bf16.msra.mxu1 (!%p1026_p5), %v1416_v3 }
  0xd5   : > { %1192 = vmatprep.subr.bf16.mxu0 (!%p1026_p5), %v1417_v4  ;;  %1237 = vmatprep.subr.bf16.mxu1 (!%p1026_p5), %v1417_v4 }
  0xd8   : > { %1193 = vmatpush3.bf16.msra.mxu0 (!%p1026_p5), %v1417_v4  ;;  %1245 = vmatpush3.bf16.msra.mxu1 (!%p1026_p5), %v1417_v4 }
  0xd9   : > { %1194 = vmatprep.subr.bf16.mxu0 (!%p1026_p5), %v1418_v11  ;;  %1238 = vmatprep.subr.bf16.mxu1 (!%p1026_p5), %v1418_v11 }
  0xdc   : > { %1195 = vmatpush3.bf16.msra.mxu0 (!%p1026_p5), %v1418_v11  ;;  %1246 = vmatpush3.bf16.msra.mxu1 (!%p1026_p5), %v1418_v11 }
  0xdd   : > { %1196 = vmatprep.subr.bf16.mxu0 (!%p1026_p5), %v1419_v12  ;;  %1239 = vmatprep.subr.bf16.mxu1 (!%p1026_p5), %v1419_v12 }
  0xe0   : > { %1197 = vmatpush3.bf16.msra.mxu0 (!%p1026_p5), %v1419_v12  ;;  %1247 = vmatpush3.bf16.msra.mxu1 (!%p1026_p5), %v1419_v12 }
  0xe1   : > { %1198 = vmatprep.subr.bf16.mxu0 (!%p1026_p5), %v1420_v13  ;;  %1240 = vmatprep.subr.bf16.mxu1 (!%p1026_p5), %v1420_v13 }
  0xe4   : > { %1199 = vmatpush3.bf16.msra.mxu0 (!%p1026_p5), %v1420_v13  ;;  %1248 = vmatpush3.bf16.msra.mxu1 (!%p1026_p5), %v1420_v13 }
  0xe5   : > { %1200 = vmatprep.subr.bf16.mxu0 (!%p1026_p5), %v1421_v14  ;;  %1241 = vmatprep.subr.bf16.mxu1 (!%p1026_p5), %v1421_v14 }
  0xe8   : > { %1201 = vmatpush3.bf16.msra.mxu0 (!%p1026_p5), %v1421_v14  ;;  %1249 = vmatpush3.bf16.msra.mxu1 (!%p1026_p5), %v1421_v14 }
 0x19d   : > { %v1172_v21 = vpop.f32.mrb[0].mxu0  ;;  %v1180_v22 = vpop.f32.mrb[0].mxu1 }
 0x19e   : > { %v526_v25 = vadd.f32 %v1172_v21, %v285_v17  ;;  %v534_v26 = vadd.f32 %v1180_v22, %v293_v18  ;;  %v461_v27 = vpop.f32.mrb[1].mxu0  ;;  %v493_v28 = vpop.f32.mrb[1].mxu1 }
 0x19f   : > { %v524_v31 = vadd.f32 %v461_v27, %v283_v19  ;;  %v532_v32 = vadd.f32 %v493_v28, %v291_v20  ;;  %v1173_v33 = vpop.f32.mrb[2].mxu0  ;;  %v1181_v34 = vpop.f32.mrb[2].mxu1 }
 0x1a0   : > { %542 = vst [vmem:[#allocation2 + $0x10] sm:$0xff] %v526_v25  ;;  %550 = vst [vmem:[#allocation2 + $0x50] sm:$0xff] %v534_v26  ;;  %v527_v35 = vadd.f32 %v1173_v33, %v286_v23  ;;  %v535_v36 = vadd.f32 %v1181_v34, %v294_v24  ;;  %v464_v37 = vpop.f32.mrb[3].mxu0  ;;  %v496_v38 = vpop.f32.mrb[3].mxu1  ;;  %v745_v33 = vlaneseq (!%p1026_p5) }
 0x1a1   : > { %540 = vst [vmem:[#allocation2] sm:$0xff] %v524_v31  ;;  %548 = vst [vmem:[#allocation2 + $0x40] sm:$0xff] %v532_v32  ;;  %v525_v39 = vadd.f32 %v464_v37, %v284_v29  ;;  %v533_v40 = vadd.f32 %v496_v38, %v292_v30 }
 0x1a2   : > { %543 = vst [vmem:[#allocation2 + $0x18] sm:$0xff] %v527_v35  ;;  %551 = vst [vmem:[#allocation2 + $0x58] sm:$0xff] %v535_v36  ;;  %v746_v34 = vand.u32 (!%p1026_p5), 127, %v745_v33 }
 0x1a3   : > { %541 = vst [vmem:[#allocation2 + $0x8] sm:$0xff] %v525_v39  ;;  %549 = vst [vmem:[#allocation2 + $0x48] sm:$0xff] %v533_v40 }
 0x1a4   : > { %vm763_vm0 = vcmp.eq.s32.totalorder (!%p1026_p5), %v746_v34, 16 }
 0x1a5   : > { %v1176_v45 = vpop.f32.mrb[4].mxu0  ;;  %v1184_v46 = vpop.f32.mrb[4].mxu1  ;;  %559 = sbr.rel (%p1026_p5) target bundleno = 660 (0x294), region = 52 }
 0x1a6   : > { %v530_v49 = vadd.f32 %v1176_v45, %v289_v41  ;;  %v538_v50 = vadd.f32 %v1184_v46, %v297_v42  ;;  %v477_v51 = vpop.f32.mrb[5].mxu0  ;;  %v509_v52 = vpop.f32.mrb[5].mxu1 }
 0x1a7   : > { %v528_v55 = vadd.f32 %v477_v51, %v287_v43  ;;  %v536_v56 = vadd.f32 %v509_v52, %v295_v44  ;;  %v1177_v57 = vpop.f32.mrb[6].mxu0  ;;  %v1185_v58 = vpop.f32.mrb[6].mxu1  ;;  %v562_v15 = vld [vmem:[#allocation2 + $0x10] sm:$0xff] (!%p1026_p5) }
 0x1a8   : > { %546 = vst [vmem:[#allocation2 + $0x30] sm:$0xff] %v530_v49  ;;  %554 = vst [vmem:[#allocation2 + $0x70] sm:$0xff] %v538_v50  ;;  %v531_v59 = vadd.f32 %v1177_v57, %v290_v47  ;;  %v539_v60 = vadd.f32 %v1185_v58, %v298_v48  ;;  %v480_v61 = vpop.f32.mrb[7].mxu0  ;;  %v512_v62 = vpop.f32.mrb[7].mxu1  ;;  %v560_v5 = vld [vmem:[#allocation2] sm:$0xff] (!%p1026_p5)  ;;  %v570_v17 = vld [vmem:[#allocation2 + $0x50] sm:$0xff] (!%p1026_p5) }
 0x1a9   : > { %544 = vst [vmem:[#allocation2 + $0x20] sm:$0xff] %v528_v55  ;;  %552 = vst [vmem:[#allocation2 + $0x60] sm:$0xff] %v536_v56  ;;  %v529_v63 = vadd.f32 %v480_v61, %v288_v53  ;;  %v537_v0 = vadd.f32 %v512_v62, %v296_v54  ;;  %v568_v7 = vld [vmem:[#allocation2 + $0x40] sm:$0xff] (!%p1026_p5)  ;;  %v563_v16 = vld [vmem:[#allocation2 + $0x18] sm:$0xff] (!%p1026_p5) }
 0x1aa   : > { %547 = vst [vmem:[#allocation2 + $0x38] sm:$0xff] %v531_v59  ;;  %555 = vst [vmem:[#allocation2 + $0x78] sm:$0xff] %v539_v60  ;;  %v561_v6 = vld [vmem:[#allocation2 + $0x8] sm:$0xff] (!%p1026_p5)  ;;  %v571_v18 = vld [vmem:[#allocation2 + $0x58] sm:$0xff] (!%p1026_p5)  ;;  %v577_v23 = vpack.c.bf16 (!%p1026_p5), %v563_v16, %v562_v15 }
 0x1ab   : > { %545 = vst [vmem:[#allocation2 + $0x28] sm:$0xff] %v529_v63  ;;  %553 = vst [vmem:[#allocation2 + $0x68] sm:$0xff] %v537_v0  ;;  %v576_v8 = vpack.c.bf16 (!%p1026_p5), %v561_v6, %v560_v5  ;;  %v569_v9 = vld [vmem:[#allocation2 + $0x48] sm:$0xff] (!%p1026_p5)  ;;  %v581_v24 = vpack.c.bf16 (!%p1026_p5), %v571_v18, %v570_v17 }
 0x1ac   : > { %v580_v10 = vpack.c.bf16 %v569_v9, %v568_v7 }
 0x1ad   : > { %1202 = vmatprep.mubr.bf16.mxu0 %v576_v8 }
 0x1ae   : > { %1210 = vmatprep.mubr.bf16.mxu1 %v580_v10  ;;  %1203 = vmatmul.mubr.bf16.vlgmr.msra.gmra.mrb[0].mxu0 %v577_v23 }
 0x1af   : > { %1211 = vmatmul.mubr.bf16.vlgmr.msra.gmra.mrb[0].mxu1 %v581_v24  ;;  %v566_v27 = vld [vmem:[#allocation2 + $0x30] sm:$0xff] }
 0x1b0   : > { %v564_v19 = vld [vmem:[#allocation2 + $0x20] sm:$0xff]  ;;  %v574_v29 = vld [vmem:[#allocation2 + $0x70] sm:$0xff] }
 0x1b1   : > { %v572_v21 = vld [vmem:[#allocation2 + $0x60] sm:$0xff]  ;;  %v567_v28 = vld [vmem:[#allocation2 + $0x38] sm:$0xff] }
 0x1b2   : > { %v565_v20 = vld [vmem:[#allocation2 + $0x28] sm:$0xff]  ;;  %v575_v30 = vld [vmem:[#allocation2 + $0x78] sm:$0xff]  ;;  %v579_v31 = vpack.c.bf16 %v567_v28, %v566_v27 }
 0x1b3   : > { %v573_v22 = vld [vmem:[#allocation2 + $0x68] sm:$0xff]  ;;  %v578_v25 = vpack.c.bf16 %v565_v20, %v564_v19  ;;  %v583_v32 = vpack.c.bf16 %v575_v30, %v574_v29 }
 0x1b4   : > { %v582_v26 = vpack.c.bf16 %v573_v22, %v572_v21 }
 0x1b5   : > { %1206 = vmatprep.mubr.bf16.mxu0 %v578_v25 }
 0x1b6   : > { %1214 = vmatprep.mubr.bf16.mxu1 %v582_v26  ;;  %1207 = vmatmul.mubr.bf16.gmra.mrb[4].mxu0 %v579_v31 }
 0x1b7   : > { %1215 = vmatmul.mubr.bf16.gmra.mrb[4].mxu1 %v583_v32 }
 0x281   : > { %v1204_v35 = vpop.f32.mrb[0].mxu0 }
 0x282   : > { %v1212_v36 = vpop.f32.mrb[0].mxu1  ;;  %v749_v37 = vmax.f32 %v1204_v35, 0.0  ;;  %v682_v39 = vpop.f32.mrb[1].mxu0 }
 0x283   : > { %v757_v38 = vmax.f32 %v1212_v36, 0.0  ;;  %v714_v40 = vpop.f32.mrb[1].mxu1  ;;  %v747_v41 = vmax.f32 %v682_v39, 0.0  ;;  %v1205_v43 = vpop.f32.mrb[2].mxu0 }
 0x284   : > { %v755_v42 = vmax.f32 %v714_v40, 0.0  ;;  %v1213_v44 = vpop.f32.mrb[2].mxu1  ;;  %v750_v45 = vmax.f32 %v1205_v43, 0.0  ;;  %v685_v47 = vpop.f32.mrb[3].mxu0  ;;  %v766_v49 = vsel %vm763_vm0, 1.0, %v749_v37 }
 0x285   : > { %v758_v46 = vmax.f32 %v1213_v44, 0.0  ;;  %v717_v48 = vpop.f32.mrb[3].mxu1  ;;  %v774_v50 = vsel %vm763_vm0, 1.0, %v757_v38  ;;  %v748_v51 = vmax.f32 %v685_v47, 0.0  ;;  %v764_v53 = vsel %vm763_vm0, 1.0, %v747_v41 }
 0x286   : > { %v756_v52 = vmax.f32 %v717_v48, 0.0  ;;  %v772_v54 = vsel %vm763_vm0, 1.0, %v755_v42  ;;  %v767_v55 = vsel %vm763_vm0, 1.0, %v750_v45 }
 0x287   : > { %v775_v56 = vsel %vm763_vm0, 1.0, %v758_v46  ;;  %v1083_v57 = vpack.c.bf16 %v767_v55, %v766_v49  ;;  %v765_v59 = vsel %vm763_vm0, 1.0, %v748_v51 }
 0x288   : > { %v1103_v58 = vpack.c.bf16 %v775_v56, %v774_v50  ;;  %v773_v60 = vsel %vm763_vm0, 1.0, %v756_v52  ;;  %v1078_v61 = vpack.c.bf16 %v765_v59, %v764_v53 }
 0x289   : > { %v1098_v62 = vpack.c.bf16 %v773_v60, %v772_v54  ;;  %1115 = vst [vmem:[%s1993_s5 + $0x8] sm:$0xff] %v1083_v57   ;;  %v1208_v63 = vpop.f32.mrb[4].mxu0 }
 0x28a   : > { %1119 = vst [vmem:[%s1993_s5 + $0x28] sm:$0xff] %v1103_v58   ;;  %v1216_v0 = vpop.f32.mrb[4].mxu1  ;;  %1079 = vst [vmem:[%s1993_s5] sm:$0xff] %v1078_v61   ;;  %v753_v1 = vmax.f32 %v1208_v63, 0.0  ;;  %v698_v3 = vpop.f32.mrb[5].mxu0 }
 0x28b   : > { %1118 = vst [vmem:[%s1993_s5 + $0x20] sm:$0xff] %v1098_v62   ;;  %v761_v2 = vmax.f32 %v1216_v0, 0.0  ;;  %v730_v4 = vpop.f32.mrb[5].mxu1  ;;  %v751_v5 = vmax.f32 %v698_v3, 0.0  ;;  %v1209_v7 = vpop.f32.mrb[6].mxu0 }
 0x28c   : > { %v759_v6 = vmax.f32 %v730_v4, 0.0  ;;  %v1217_v8 = vpop.f32.mrb[6].mxu1  ;;  %v754_v9 = vmax.f32 %v1209_v7, 0.0  ;;  %v701_v11 = vpop.f32.mrb[7].mxu0  ;;  %v770_v13 = vsel %vm763_vm0, 1.0, %v753_v1 }
 0x28d   : > { %v762_v10 = vmax.f32 %v1217_v8, 0.0  ;;  %v733_v12 = vpop.f32.mrb[7].mxu1  ;;  %v778_v14 = vsel %vm763_vm0, 1.0, %v761_v2  ;;  %v752_v15 = vmax.f32 %v701_v11, 0.0  ;;  %v768_v17 = vsel %vm763_vm0, 1.0, %v751_v5 }
 0x28e   : > { %v760_v16 = vmax.f32 %v733_v12, 0.0  ;;  %v776_v18 = vsel %vm763_vm0, 1.0, %v759_v6  ;;  %v771_v19 = vsel %vm763_vm0, 1.0, %v754_v9 }
 0x28f   : > { %v779_v20 = vsel %vm763_vm0, 1.0, %v762_v10  ;;  %v1093_v21 = vpack.c.bf16 %v771_v19, %v770_v13  ;;  %v769_v23 = vsel %vm763_vm0, 1.0, %v752_v15 }
 0x290   : > { %v1113_v22 = vpack.c.bf16 %v779_v20, %v778_v14  ;;  %v777_v24 = vsel %vm763_vm0, 1.0, %v760_v16  ;;  %v1088_v25 = vpack.c.bf16 %v769_v23, %v768_v17 }
 0x291   : > { %v1108_v26 = vpack.c.bf16 %v777_v24, %v776_v18  ;;  %1117 = vst [vmem:[%s1993_s5 + $0x18] sm:$0xff] %v1093_v21  }
 0x292   : > { %1121 = vst [vmem:[%s1993_s5 + $0x38] sm:$0xff] %v1113_v22   ;;  %1116 = vst [vmem:[%s1993_s5 + $0x10] sm:$0xff] %v1088_v25  }
 0x293   : > { %1120 = vst [vmem:[%s1993_s5 + $0x30] sm:$0xff] %v1108_v26  }
 0x294 PF: > { %s2187_s13 = sld [smem:[#allocation17_spill]]  ;;  %s2189_s27 = sld [smem:[#allocation20_spill]] }
 0x295   : > { %s2190_s3 = sld [smem:[#allocation24_spill]]  ;;  %s874_s4 = sshll.u32 %s1993_s5, 4  ;;  %s2044_s4 = int_to_ptr.vmem [resolvable:$true] %s874_s4 }
 0x296   : > { %s2048_s6 = scalar_lea.sflag [#allocation5], %s256_s9  ;;  %s1510_s11 = scalar_lea.vmem %s2044_s4, 1024 }
 0x297   : > { %p1511_p2 = scmp.ne.s32.totalorder %s2044_s4, %s1510_s11  ;;  %s1673_s29 = smov [#allocation9]  }
 0x298   : > { %s1514_s22 = sshll.u32 %s1673_s29, 4  ;;  %s1515_s22 = int_to_ptr.vmem [resolvable:$false] %s1514_s22 }
 0x299   : > { %s1516_s26 = scalar_lea.vmem %s1515_s22, 2048  ;;  %p1517_p4 = scmp.lt.s32.totalorder %s2044_s4, %s1515_s22 }
 0x29a   : > { %s1074_s7 = sshll.u32 %s2187_s13, 10  ;;  %p2191_p10 = scmp.ne.s32.totalorder %s2189_s27, 0 }
 0x29b   : > { %s2041_s30 = scalar_lea.hbm %s2190_s3, %s1074_s7  ;;  %p1518_p8 = scmp.lt.s32.totalorder %s1516_s26, %s1510_s11 }
 0x29c   : > { %p1512_p0 = pnand %p1511_p2, %p2191_p10 }
 0x29d   : > { %p1519_p12 = por %p1518_p8, %p1517_p4 }
 0x29e   : > { %p1513_p11 = pneg %p1512_p0 }
 0x2a0   : > { %p1520_p13 = pnand %p1519_p12, %p1513_p11 }
 0x2a2   : > { %1523 = shalt.err (!%p1520_p13)
}
 0x2a3   : > { %s1524_s9 = scalar_lea.hbm %s2041_s30, 1024  ;;  %s1528_s13 = scalar_lea.hbm %s2190_s3, 2048 }
 0x2a4   : > { %p1525_p6 = scmp.ne.s32.totalorder %s2041_s30, %s1524_s9  ;;  %p1529_p3 = scmp.lt.u32.totalorder %s2041_s30, %s2190_s3 }
 0x2a5   : > { %p1530_p9 = scmp.lt.u32.totalorder %s1528_s13, %s1524_s9  ;;  %p1532_p2 = scmp.lt.u32.totalorder %s1524_s9, %s2041_s30 }
 0x2a6   : > { %p1526_p7 = pnand %p1525_p6, %p2191_p10 }
 0x2a7   : > { %p1531_p5 = por %p1530_p9, %p1529_p3 }
 0x2a8   : > { %p1527_p1 = pneg %p1526_p7 }
 0x2a9   : > { %p1533_p0 = por %p1532_p2, %p1531_p5 }
 0x2ab   : > { %p1534_p11 = pnand %p1533_p0, %p1527_p1 }
 0x2ad   : > { %1537 = shalt.err (!%p1534_p11)
}
 0x2ae   : > { %s1674_s21 = smov 64   ;;  %s1675_s8 = smov 4  }
 0x2af   : > { %1258 = dma.vmem_to_hbm [thread:$0]  (%p2191_p10), %s2044_s4, 1024, %s2041_s30, %s2048_s6, %s1674_s21, %s1674_s21, %s1675_s8  }
 0x2b0 PF: > { %s2192_s11 = sld [smem:[#allocation14_spill]]  ;;  %s2193_s29 = sld [smem:[#allocation21_spill]] }
 0x2b1   : > { %p1278_p4 = scmp.ge.s32.totalorder %s1664_s25, 2 }
 0x2b6   : > { %s889_s22 = sand.u32 1, %s2192_s11   ;;  %p2194_p8 = scmp.ne.s32.totalorder %s2193_s29, 0 }
 0x2b7   : > { %s890_s26 = scalar_lea.sflag [#allocation5], %s889_s22 }
 0x2b8   : > { %p1272_p12 = pnand %p1278_p4, %p2194_p8 }
 0x2ba   : > { %1607 = dma.done.wait (!%p1272_p12), %s890_s26, 1024  }
 0x2bb   : > { %1609 = vsyncadd (!%p1272_p12), %s890_s26, 4294966272  ;;  %s22_s25 = sadd.s32 1, %s1664_s25   ;;  %s2196_s5 = sld [smem:[#allocation15_spill]] }
 0x2bc   : > { %p2077_p13 = scmp.ge.s32.totalorder %s22_s25, 6   ;;  %s2197_s27 = smov %s1862_s12 }
 0x2bd   : > { %s2198_s30 = sld [smem:[#allocation22_spill]]  ;;  %s2199_s4 = smov %s2218_s18 }
 0x2be   : > { %s2201_s13 = smov %s1620_s14  ;;  %s2202_s14 = smov %s1859_s15 }
 0x2bf   : > { %s2203_s15 = smov %s1628_s16  ;;  %s2204_s16 = smov %s1632_s17 }
 0x2c0   : > { %s2205_s17 = smov %s1917_s2  ;;  %s2206_s18 = smov %s1640_s19 }
 0x2c1   : > { %s2200_s12 = smov %s2196_s5  ;;  %s2207_s19 = smov %s1644_s20 }
 0x2c2   : > { %s2208_s20 = smov %s2197_s27  ;;  %s2209_s21 = smov %s1656_s23 }
 0x2c3   : > { %s2210_s22 = smov %s1660_s24  ;;  %s2211_s23 = smov %s2198_s30 }
 0x2c4   : > { %s2212_s24 = smov %s2199_s4  ;;  %21 = sbr.rel (!%p2077_p13) target bundleno = 15 (0xf), region = 102 }
 0x2cb   :  { %895 = vsyncpa [#allocation4], 1 }
 0x2cc   :  { %897 = vsyncpa [#allocation4 + $0x1], 1 }
 0x2cd   :  { %898 = vsyncpa [#allocation7], 1 }
 0x2ce   :  { %900 = vsyncpa [#allocation7 + $0x1], 1 }
 0x2cf   :  { %901 = vsyncpa [#allocation5], 1 }
 0x2d0   :  { %903 = vsyncpa [#allocation5 + $0x1], 1 }

</bundles_post_ra>
